<compile_context>
chip_gen: v5e
topology: v5e:2x2
jax: 0.10.0
libtpu: 0.0.40
codegen_flags: <defaults>
</compile_context>

<pallas_src>
import functools

import jax
import jax.numpy as jnp
import numpy as np
from jax import lax
from jax.experimental import pallas as pl
from jax.experimental.pallas import tpu as pltpu

LANE = 128            # TPU lane width == padded fused-head output width
OUT_LANES = 2 * LANE  # packed output slab width (256)
_NEG_BIG = -1e30      # finite "-inf": keeps 0 * masked_log_prob == 0 (no NaN)


# ----------------------------------------------------------------------------
# Fused Pallas kernel: projection + heads + categorical distribution + selection
# ----------------------------------------------------------------------------
def _policy_act_kernel(pose_ref, wp_ref, wh_ref, out_ref, *, dim_actions):
    A = dim_actions
    pose = pose_ref[...]                      # (Bt, Din) f32
    wp = wp_ref[...]                          # (Din, H)  f32
    H = wp.shape[1]
    wf = wh_ref[0:H, :]                       # (H, 128) cols [0:A)=Wa^T, col A=Wc^T, rest 0
    bf = wh_ref[H:H + 1, :]                   # (1, 128) lanes [0:A)=ba, lane A=bc, rest 0

    Bt = pose.shape[0]

    # Stand-in policy feature encoder (external self.policy), fused in: MXU + EUP tanh.
    feats = jnp.tanh(jnp.dot(pose, wp, preferred_element_type=jnp.float32))        # (Bt, H)

    # Single fused head matmul: action logits and critic value in one MXU pass.
    lin = jnp.dot(feats, wf, preferred_element_type=jnp.float32) + bf              # (Bt, 128)

    col = lax.broadcasted_iota(jnp.int32, (Bt, LANE), 1)                            # lane index
    is_act = col < A
    logits_p = jnp.where(is_act, lin, jnp.float32(_NEG_BIG))                        # mask padded lanes

    # Numerically-stable categorical distribution over the full 128-lane width.
    m = jnp.max(logits_p, axis=-1, keepdims=True)                                   # (Bt, 1)
    z = logits_p - m
    ez = jnp.exp(z)
    s = jnp.sum(ez, axis=-1, keepdims=True)                                         # (Bt, 1)
    log_s = jnp.log(s)
    log_probs = z - log_s                                                           # (Bt, 128)
    probs = ez / s                                                                  # exact division
    # Padded lanes: probs == 0 exactly, log_probs finite (-1e30) -> 0 * finite = 0.
    entropy = -jnp.sum(probs * log_probs, axis=-1, keepdims=True)                   # (Bt, 1)

    # Critic value lives in lane A of the fused linear output (XLU filler reduce).
    value = jnp.sum(jnp.where(col == A, lin, 0.0), axis=-1, keepdims=True)          # (Bt, 1)

    # dist.mode(): first lane attaining the max logit (matches torch argmax).
    col_f = col.astype(jnp.float32)
    is_max = jnp.logical_and(logits_p == m, is_act)
    action_f = jnp.min(jnp.where(is_max, col_f, jnp.float32(LANE)),
                       axis=-1, keepdims=True)                                      # (Bt, 1) float idx

    # dist.log_probs(mode()): the argmax lane has z == 0 exactly, so its log-prob is
    # -log(sum(exp(z))). Bit-exact; removes a select + a full 128-lane reduce.
    alp = -log_s                                                                    # (Bt, 1)

    # Per-block mean entropy (exact mean for the single-block path; the tiled path
    # averages per-row entropy in the wrapper instead).
    ent_mean = jnp.sum(entropy, axis=0, keepdims=True) * jnp.float32(1.0 / Bt)      # (1, 1)

    # Per-row constant so the wrapper can reconstruct logits = log_probs + logit_off.
    logit_off = m + log_s                                                           # (Bt, 1)

    # Scal block built fully in-register: feats at lanes [0:H), scalars after.
    scal = jnp.concatenate(
        [feats, jnp.zeros((Bt, LANE - H), jnp.float32)], axis=-1)                   # (Bt, 128)
    scal = jnp.where(col == H + 0, entropy, scal)
    scal = jnp.where(col == H + 1, value, scal)
    scal = jnp.where(col == H + 2, action_f, scal)
    scal = jnp.where(col == H + 3, alp, scal)
    scal = jnp.where(col == H + 4, ent_mean, scal)
    scal = jnp.where(col == H + 5, logit_off, scal)

    # Lane-dense packed output: exactly two aligned, unmasked 128-lane stores.
    out_ref[:, 0 * LANE:1 * LANE] = log_probs
    out_ref[:, 1 * LANE:2 * LANE] = scal


# ----------------------------------------------------------------------------
# pallas_call wrapper
# ----------------------------------------------------------------------------
def policy_act_fused(pose_flat, wp, w_head, *, dim_actions, tile_b=1024):
    """pose_flat: (B, Din); wp: (Din, H); w_head: (H+1, 128) with bias in last row.

    Returns (packed (B, 256) f32 slab, used_grid flag)."""
    B, Din = pose_flat.shape
    H = wp.shape[1]
    assert dim_actions >= 1, "dim_actions must be >= 1"
    assert dim_actions + 1 <= LANE, "action logits + critic lane must fit in 128 lanes"
    assert H + 6 <= LANE, "feats + scalar lanes must fit in one 128-lane block"
    assert w_head.shape == (H + 1, LANE)

    kernel = functools.partial(_policy_act_kernel, dim_actions=dim_actions)

    cost = pl.CostEstimate(
        flops=int(2 * B * Din * H + 2 * B * H * LANE + 24 * B * LANE),
        transcendentals=int(B * H + B * LANE + 2 * B),
        bytes_accessed=int(4 * (B * Din + Din * H + (H + 1) * LANE + B * OUT_LANES)),
    )

    use_grid = B > tile_b
    if not use_grid:
        # Small batch: single block, everything resident in VMEM, one DMA per array.
        vmem = functools.partial(pl.BlockSpec, memory_space=pltpu.MemorySpace.VMEM)
        packed = pl.pallas_call(
            kernel,
            out_shape=jax.ShapeDtypeStruct((B, OUT_LANES), jnp.float32),
            in_specs=[vmem(), vmem(), vmem()],
            out_specs=vmem(),
            cost_estimate=cost,
        )(pose_flat, wp, w_head)
        return packed, False

    # Large batch: pad B up to a multiple of tile_b (never fall back to one giant
    # unpipelined block), tile over B; weights stay resident (index_map -> (0, 0)).
    # The parallel axis lets v7x shard grid steps across its 2 TensorCores.
    n_tiles = pl.cdiv(B, tile_b)
    b_pad = n_tiles * tile_b
    if b_pad != B:
        pose_flat = jnp.pad(pose_flat, ((0, b_pad - B), (0, 0)))
    packed = pl.pallas_call(
        kernel,
        out_shape=jax.ShapeDtypeStruct((b_pad, OUT_LANES), jnp.float32),
        grid_spec=pltpu.PrefetchScalarGridSpec(
            num_scalar_prefetch=0,
            grid=(n_tiles,),
            in_specs=[
                pl.BlockSpec((tile_b, Din), lambda i: (i, 0)),
                pl.BlockSpec((Din, H), lambda i: (0, 0)),
                pl.BlockSpec((H + 1, LANE), lambda i: (0, 0)),
            ],
            out_specs=pl.BlockSpec((tile_b, OUT_LANES), lambda i: (i, 0)),
        ),
        compiler_params=pltpu.CompilerParams(dimension_semantics=("parallel",)),
        cost_estimate=cost,
    )(pose_flat, wp, w_head)
    return packed[:B], True


# ----------------------------------------------------------------------------
# build_policy_observation: gather-then-shape glue (plain JAX, same semantics)
# ----------------------------------------------------------------------------
def _select_step(x, idx):
    """x: (B, num_agents, num_steps, ...); idx: (B,) int32 -> (B, num_agents, ...).

    Gathers the timestep FIRST (no transpose of the big tensors), which is
    semantically identical to the reference permute(0,2,1,...)[bs_rng, idx]."""
    idx_b = idx.reshape((x.shape[0],) + (1,) * (x.ndim - 1))
    return jnp.take_along_axis(x, idx_b, axis=2).squeeze(2)


def build_policy_observation(observation):
    po = {}
    cur_idx = observation["current_context_idx"][..., 0].astype(jnp.int32)  # (B,)
    num_steps = observation["current_context_pose"].shape[2]
    # Like the torch reference, prev_idx = cur_idx - 1 wraps to the last timestep if
    # cur_idx == 0 (negative-index wrap); made explicit with a modulo here.
    prev_idx = (cur_idx - 1) % num_steps

    # pose inputs: (B, num_agents, num_steps, 5)
    selfPose = observation["current_context_pose"]
    po["prevNcurr_allAgnts_selfPose"] = jnp.stack(
        [_select_step(selfPose, prev_idx), _select_step(selfPose, cur_idx)], axis=1)

    # view inputs
    po["prev_allAgnts_view_mask"] = _select_step(
        observation["previous_context_view_mask"], prev_idx)
    po["prev_allAgnts_map"] = _select_step(observation["current_context_map"], prev_idx)
    po["prev_allAgnts_rgb"] = _select_step(observation["current_context_rgb"], prev_idx)

    # self audio inputs
    sa_mask = observation["current_context_audio_mask"]
    po["prevNcurr_allAgnts_selfAudio_mask"] = jnp.stack(
        [_select_step(sa_mask, prev_idx), _select_step(sa_mask, cur_idx)], axis=1)
    selfAudio = observation["current_context_selfAudio"]
    po["prevNcurr_allAgnts_selfAudio"] = jnp.stack(
        [_select_step(selfAudio, prev_idx), _select_step(selfAudio, cur_idx)], axis=1)

    # audio from other ego inputs
    otherPose = observation["current_context_otherAudio_pose"]
    po["prevNcurr_allAgnts_otherPose"] = jnp.stack(
        [_select_step(otherPose, prev_idx), _select_step(otherPose, cur_idx)], axis=1)
    oa_mask = observation["current_context_audio_mask"][:, jnp.array([1, 0]), :]
    po["prevNcurr_allAgnts_otherAudio_mask"] = jnp.stack(
        [_select_step(oa_mask, prev_idx), _select_step(oa_mask, cur_idx)], axis=1)
    otherAudio = observation["current_context_otherAudio"]
    po["prevNcurr_allAgnts_otherAudio"] = jnp.stack(
        [_select_step(otherAudio, prev_idx), _select_step(otherAudio, cur_idx)], axis=1)
    return po


# ----------------------------------------------------------------------------
# act(): end-to-end wrapper mirroring Policy.act (deterministic mode)
# ----------------------------------------------------------------------------
def act(observation, feats_proj_w, w_head, *, dim_actions):
    policy_observation = build_policy_observation(observation)
    # TODO(synk): external self.policy (RNN state encoder) / self.mapper are not part
    # of this module's own parameters; stand-in deterministic linear+tanh projection
    # over the pose summary is fused INTO the Pallas kernel below.
    pose = policy_observation["prevNcurr_allAgnts_selfPose"]
    pose_flat = pose.reshape(pose.shape[0], -1)

    packed, used_grid = policy_act_fused(
        pose_flat, feats_proj_w, w_head, dim_actions=dim_actions)

    A = dim_actions
    H = feats_proj_w.shape[1]
    log_probs = packed[:, :A]
    scal = packed[:, LANE:2 * LANE]
    feats = scal[:, :H]
    entropy = scal[:, H + 0:H + 1]
    value = scal[:, H + 1:H + 2]
    action = scal[:, H + 2:H + 3].astype(jnp.int32)            # dist.mode()
    action_log_probs = scal[:, H + 3:H + 4]
    logit_off = scal[:, H + 5:H + 6]
    logits = log_probs + logit_off                             # cheap wrapper reconstruction
    probs = jnp.exp(log_probs)
    dist_entropy = jnp.mean(entropy) if used_grid else scal[0, H + 4]
    # TODO(synk): dist.sample() (stochastic path) and rnn_hidden_states belong to the
    # external policy; only the deterministic mode() path is implemented here.
    return value, action, action_log_probs, dist_entropy, probs, logits, feats, log_probs


# ----------------------------------------------------------------------------
# main
# ----------------------------------------------------------------------------
if __name__ == "__main__":
    key = jax.random.PRNGKey(0)
    B, num_agents, num_steps = 2, 2, 4
    pose_dim = 5
    H = 32              # policy.output_size
    dim_actions = 4
    map_hw, map_c = 8, 2
    rgb_hw, rgb_c = 16, 3
    aud_f, aud_t = 8, 8

    ks = jax.random.split(key, 16)

    observation = {
        "current_context_idx": jax.random.randint(ks[0], (B, 1), 1, num_steps).astype(jnp.float32),
        "current_context_pose": jax.random.normal(ks[1], (B, num_agents, num_steps, pose_dim), jnp.float32),
        "previous_context_view_mask": jax.random.bernoulli(ks[2], 0.5, (B, num_agents, num_steps)).astype(jnp.float32),
        "current_context_map": jax.random.normal(ks[3], (B, num_agents, num_steps, map_hw, map_hw, map_c), jnp.float32),
        "current_context_rgb": jax.random.normal(ks[4], (B, num_agents, num_steps, rgb_hw, rgb_hw, rgb_c), jnp.float32),
        "current_context_audio_mask": jax.random.bernoulli(ks[5], 0.5, (B, num_agents, num_steps)).astype(jnp.float32),
        "current_context_selfAudio": jax.random.normal(ks[6], (B, num_agents, num_steps, aud_f, aud_t), jnp.float32),
        "current_context_otherAudio_pose": jax.random.normal(ks[7], (B, num_agents, num_steps, pose_dim), jnp.float32),
        "current_context_otherAudio": jax.random.normal(ks[8], (B, num_agents, num_steps, aud_f, aud_t), jnp.float32),
    }

    # Deterministic parameter init (mirrors nn.init.orthogonal_ + zero bias).
    ortho = jax.nn.initializers.orthogonal()
    ortho_small = jax.nn.initializers.orthogonal(scale=0.01)
    Wa = ortho_small(ks[9], (dim_actions, H), jnp.float32)   # CategoricalNet weight (out, in)
    ba = jnp.zeros((dim_actions,), jnp.float32)
    Wc = ortho(ks[10], (1, H), jnp.float32)                  # CriticHead weight (out, in)
    bc = jnp.zeros((1,), jnp.float32)
    # Stand-in feature projector for the external policy network.
    feats_proj_w = jax.random.normal(ks[11], (2 * num_agents * pose_dim, H), jnp.float32) * 0.1

    # Fuse the two heads + bias into ONE (H+1, 128) lane-padded weight (3 input streams).
    W_head = jnp.zeros((H + 1, LANE), jnp.float32)
    W_head = W_head.at[:H, :dim_actions].set(Wa.T)
    W_head = W_head.at[:H, dim_actions].set(Wc[0])
    W_head = W_head.at[H, :dim_actions].set(ba)
    W_head = W_head.at[H, dim_actions].set(bc[0])

    act_fn = jax.jit(functools.partial(act, dim_actions=dim_actions))
    (value, action, action_log_probs, dist_entropy,
     probs, logits, feats, log_probs) = jax.block_until_ready(
        act_fn(observation, feats_proj_w, W_head))

    # Pure-JAX reference.
    po_ref = build_policy_observation(observation)
    pose_flat_ref = po_ref["prevNcurr_allAgnts_selfPose"].reshape(B, -1)
    ref_feats = jnp.tanh(pose_flat_ref @ feats_proj_w)
    ref_logits = ref_feats @ Wa.T + ba[None, :]
    ref_value = ref_feats @ Wc.T + bc[None, :]
    ref_logp = jax.nn.log_softmax(ref_logits, axis=-1)
    ref_probs = jax.nn.softmax(ref_logits, axis=-1)
    ref_entropy = -jnp.sum(ref_probs * ref_logp, axis=-1, keepdims=True)
    ref_dist_entropy = jnp.mean(ref_entropy)

    np.testing.assert_allclose(np.asarray(feats), np.asarray(ref_feats), rtol=1e-5, atol=1e-5)
    np.testing.assert_allclose(np.asarray(logits), np.asarray(ref_logits), rtol=1e-5, atol=1e-5)
    np.testing.assert_allclose(np.asarray(value), np.asarray(ref_value), rtol=1e-5, atol=1e-5)
    np.testing.assert_allclose(np.asarray(probs), np.asarray(ref_probs), rtol=1e-5, atol=1e-5)
    np.testing.assert_allclose(np.asarray(log_probs), np.asarray(ref_logp), rtol=1e-5, atol=1e-5)
    np.testing.assert_allclose(np.asarray(dist_entropy), np.asarray(ref_dist_entropy),
                               rtol=1e-5, atol=1e-5)
    # In-kernel argmax (mode) and the -log_s log-prob identity are consistent with the dist.
    np.testing.assert_array_equal(np.asarray(action[:, 0]),
                                  np.asarray(jnp.argmax(logits, axis=-1)))
    np.testing.assert_allclose(
        np.asarray(action_log_probs),
        np.asarray(jnp.take_along_axis(log_probs, action, axis=-1)), rtol=1e-6, atol=1e-6)
    assert value.shape == (B, 1) and action.shape == (B, 1) and action_log_probs.shape == (B, 1)

    # --- Grid-path sanity check (forces B-padding + multi-step grid with tile_b=8) ---
    Bg = 20
    pose_g = jax.random.normal(ks[12], (Bg, 2 * num_agents * pose_dim), jnp.float32)
    packed_g, used_grid = policy_act_fused(pose_g, feats_proj_w, W_head,
                                           dim_actions=dim_actions, tile_b=8)
    packed_g = jax.block_until_ready(packed_g)
    assert used_grid and packed_g.shape == (Bg, OUT_LANES)
    fg = jnp.tanh(pose_g @ feats_proj_w)
    lg = fg @ Wa.T + ba[None, :]
    vg = fg @ Wc.T + bc[None, :]
    np.testing.assert_allclose(np.asarray(packed_g[:, LANE:LANE + H]), np.asarray(fg),
                               rtol=1e-5, atol=1e-5)
    np.testing.assert_allclose(
        np.asarray(packed_g[:, :dim_actions] + packed_g[:, LANE + H + 5:LANE + H + 6]),
        np.asarray(lg), rtol=1e-5, atol=1e-5)
    np.testing.assert_allclose(np.asarray(packed_g[:, LANE + H + 1:LANE + H + 2]),
                               np.asarray(vg), rtol=1e-5, atol=1e-5)

    print("KERNEL_OK")
</pallas_src>

<mosaic_0001>
module attributes {stable_mosaic.version = 11 : i64} {
  func.func @_policy_act_kernel(%arg0: memref<2x20xf32, #tpu.memory_space<vmem>>, %arg1: memref<20x32xf32, #tpu.memory_space<vmem>>, %arg2: memref<33x128xf32, #tpu.memory_space<vmem>>, %arg3: memref<2x256xf32, #tpu.memory_space<vmem>>) attributes {dimension_semantics = [], scalar_prefetch = 0 : i64, scratch_operands = 0 : i64, tpu.core_type = #tpu.core_type<tc>} {
    %c0 = arith.constant 0 : index
    %c0_0 = arith.constant 0 : index
    %0 = vector.load %arg0[%c0, %c0_0] : memref<2x20xf32, #tpu.memory_space<vmem>>, vector<2x20xf32>
    %c0_1 = arith.constant 0 : index
    %c0_2 = arith.constant 0 : index
    %1 = vector.load %arg1[%c0_1, %c0_2] : memref<20x32xf32, #tpu.memory_space<vmem>>, vector<20x32xf32>
    %c0_3 = arith.constant 0 : index
    %c0_4 = arith.constant 0 : index
    %2 = vector.load %arg2[%c0_3, %c0_4] : memref<33x128xf32, #tpu.memory_space<vmem>>, vector<32x128xf32>
    %c32 = arith.constant 32 : index
    %c0_5 = arith.constant 0 : index
    %3 = vector.load %arg2[%c32, %c0_5] : memref<33x128xf32, #tpu.memory_space<vmem>>, vector<1x128xf32>
    %cst = arith.constant dense<0.000000e+00> : vector<2x32xf32>
    %4 = tpu.matmul %0, %1, %cst {dimension_numbers = #tpu.dot_dimension_numbers<[1], [0], [0], [1], [0, 0, 1, 1], [], []>} : vector<2x20xf32>, vector<20x32xf32>, vector<2x32xf32> -> vector<2x32xf32>
    %5 = math.tanh %4 : vector<2x32xf32>
    %cst_6 = arith.constant dense<0.000000e+00> : vector<2x128xf32>
    %6 = tpu.matmul %5, %2, %cst_6 {dimension_numbers = #tpu.dot_dimension_numbers<[1], [0], [0], [1], [0, 0, 1, 1], [], []>} : vector<2x32xf32>, vector<32x128xf32>, vector<2x128xf32> -> vector<2x128xf32>
    %7 = vector.broadcast %3 : vector<1x128xf32> to vector<2x128xf32>
    %8 = arith.addf %6, %7 : vector<2x128xf32>
    %9 = tpu.iota {dimensions = array<i32: 1>} : vector<2x128xi32>
    %c4_i32 = arith.constant 4 : i32
    %10 = vector.broadcast %c4_i32 : i32 to vector<2x128xi32>
    %11 = arith.cmpi slt, %9, %10 : vector<2x128xi32>
    %cst_7 = arith.constant -1.000000e+30 : f32
    %12 = vector.broadcast %cst_7 : f32 to vector<2x128xf32>
    %13 = arith.select %11, %8, %12 : vector<2x128xi1>, vector<2x128xf32>
    %cst_8 = arith.constant dense<0xFF800000> : vector<2xf32>
    %14 = vector.multi_reduction <maximumf>, %13, %cst_8 [1] : vector<2x128xf32> to vector<2xf32>
    %15 = vector.shape_cast %14 : vector<2xf32> to vector<2x1xf32>
    %16 = vector.broadcast %15 : vector<2x1xf32> to vector<2x128xf32>
    %17 = arith.subf %13, %16 : vector<2x128xf32>
    %18 = math.exp %17 : vector<2x128xf32>
    %cst_9 = arith.constant dense<0.000000e+00> : vector<2xf32>
    %19 = vector.multi_reduction <add>, %18, %cst_9 [1] : vector<2x128xf32> to vector<2xf32>
    %20 = vector.shape_cast %19 : vector<2xf32> to vector<2x1xf32>
    %21 = math.log %20 : vector<2x1xf32>
    %22 = vector.broadcast %21 : vector<2x1xf32> to vector<2x128xf32>
    %23 = arith.subf %17, %22 : vector<2x128xf32>
    %24 = vector.broadcast %20 : vector<2x1xf32> to vector<2x128xf32>
    %25 = arith.divf %18, %24 : vector<2x128xf32>
    %26 = arith.mulf %25, %23 : vector<2x128xf32>
    %cst_10 = arith.constant dense<0.000000e+00> : vector<2xf32>
    %27 = vector.multi_reduction <add>, %26, %cst_10 [1] : vector<2x128xf32> to vector<2xf32>
    %28 = vector.shape_cast %27 : vector<2xf32> to vector<2x1xf32>
    %cst_11 = arith.constant 0.000000e+00 : f32
    %29 = vector.broadcast %cst_11 : f32 to vector<2x1xf32>
    %30 = arith.subf %29, %28 : vector<2x1xf32>
    %c4_i32_12 = arith.constant 4 : i32
    %31 = vector.broadcast %c4_i32_12 : i32 to vector<2x128xi32>
    %32 = arith.cmpi eq, %9, %31 : vector<2x128xi32>
    %cst_13 = arith.constant 0.000000e+00 : f32
    %33 = vector.broadcast %cst_13 : f32 to vector<2x128xf32>
    %34 = arith.select %32, %8, %33 : vector<2x128xi1>, vector<2x128xf32>
    %cst_14 = arith.constant dense<0.000000e+00> : vector<2xf32>
    %35 = vector.multi_reduction <add>, %34, %cst_14 [1] : vector<2x128xf32> to vector<2xf32>
    %36 = vector.shape_cast %35 : vector<2xf32> to vector<2x1xf32>
    %37 = arith.sitofp %9 : vector<2x128xi32> to vector<2x128xf32>
    %38 = vector.broadcast %15 : vector<2x1xf32> to vector<2x128xf32>
    %39 = arith.cmpf oeq, %13, %38 : vector<2x128xf32>
    %40 = arith.andi %39, %11 : vector<2x128xi1>
    %cst_15 = arith.constant 1.280000e+02 : f32
    %41 = vector.broadcast %cst_15 : f32 to vector<2x128xf32>
    %42 = arith.select %40, %37, %41 : vector<2x128xi1>, vector<2x128xf32>
    %cst_16 = arith.constant dense<0x7F800000> : vector<2xf32>
    %43 = vector.multi_reduction <minimumf>, %42, %cst_16 [1] : vector<2x128xf32> to vector<2xf32>
    %44 = vector.shape_cast %43 : vector<2xf32> to vector<2x1xf32>
    %cst_17 = arith.constant 0.000000e+00 : f32
    %45 = vector.broadcast %cst_17 : f32 to vector<2x1xf32>
    %46 = arith.subf %45, %21 : vector<2x1xf32>
    %cst_18 = arith.constant dense<0.000000e+00> : vector<1xf32>
    %47 = vector.multi_reduction <add>, %30, %cst_18 [0] : vector<2x1xf32> to vector<1xf32>
    %48 = vector.shape_cast %47 : vector<1xf32> to vector<1x1xf32>
    %cst_19 = arith.constant 5.000000e-01 : f32
    %49 = vector.broadcast %cst_19 : f32 to vector<1x1xf32>
    %50 = arith.mulf %48, %49 : vector<1x1xf32>
    %51 = arith.addf %15, %21 : vector<2x1xf32>
    %cst_20 = arith.constant 0.000000e+00 : f32
    %52 = vector.broadcast %cst_20 : f32 to vector<2x96xf32>
    %53 = tpu.concatenate %5, %52 in 1 : vector<2x32xf32>, vector<2x96xf32> -> vector<2x128xf32>
    %c32_i32 = arith.constant 32 : i32
    %54 = vector.broadcast %c32_i32 : i32 to vector<2x128xi32>
    %55 = arith.cmpi eq, %9, %54 : vector<2x128xi32>
    %56 = vector.shape_cast %30 : vector<2x1xf32> to vector<2x1xf32>
    %57 = vector.broadcast %56 : vector<2x1xf32> to vector<2x128xf32>
    %58 = arith.select %55, %57, %53 : vector<2x128xi1>, vector<2x128xf32>
    %c33_i32 = arith.constant 33 : i32
    %59 = vector.broadcast %c33_i32 : i32 to vector<2x128xi32>
    %60 = arith.cmpi eq, %9, %59 : vector<2x128xi32>
    %61 = vector.shape_cast %36 : vector<2x1xf32> to vector<2x1xf32>
    %62 = vector.broadcast %61 : vector<2x1xf32> to vector<2x128xf32>
    %63 = arith.select %60, %62, %58 : vector<2x128xi1>, vector<2x128xf32>
    %c34_i32 = arith.constant 34 : i32
    %64 = vector.broadcast %c34_i32 : i32 to vector<2x128xi32>
    %65 = arith.cmpi eq, %9, %64 : vector<2x128xi32>
    %66 = vector.shape_cast %44 : vector<2x1xf32> to vector<2x1xf32>
    %67 = vector.broadcast %66 : vector<2x1xf32> to vector<2x128xf32>
    %68 = arith.select %65, %67, %63 : vector<2x128xi1>, vector<2x128xf32>
    %c35_i32 = arith.constant 35 : i32
    %69 = vector.broadcast %c35_i32 : i32 to vector<2x128xi32>
    %70 = arith.cmpi eq, %9, %69 : vector<2x128xi32>
    %71 = vector.shape_cast %46 : vector<2x1xf32> to vector<2x1xf32>
    %72 = vector.broadcast %71 : vector<2x1xf32> to vector<2x128xf32>
    %73 = arith.select %70, %72, %68 : vector<2x128xi1>, vector<2x128xf32>
    %c36_i32 = arith.constant 36 : i32
    %74 = vector.broadcast %c36_i32 : i32 to vector<2x128xi32>
    %75 = arith.cmpi eq, %9, %74 : vector<2x128xi32>
    %76 = vector.shape_cast %50 : vector<1x1xf32> to vector<1x1xf32>
    %77 = vector.broadcast %76 : vector<1x1xf32> to vector<2x128xf32>
    %78 = arith.select %75, %77, %73 : vector<2x128xi1>, vector<2x128xf32>
    %c37_i32 = arith.constant 37 : i32
    %79 = vector.broadcast %c37_i32 : i32 to vector<2x128xi32>
    %80 = arith.cmpi eq, %9, %79 : vector<2x128xi32>
    %81 = vector.shape_cast %51 : vector<2x1xf32> to vector<2x1xf32>
    %82 = vector.broadcast %81 : vector<2x1xf32> to vector<2x128xf32>
    %83 = arith.select %80, %82, %78 : vector<2x128xi1>, vector<2x128xf32>
    %c0_21 = arith.constant 0 : index
    %c0_22 = arith.constant 0 : index
    %84 = vector.load %arg3[%c0_21, %c0_22] : memref<2x256xf32, #tpu.memory_space<vmem>>, vector<2x128xf32>
    tpu.vector_store %arg3[%c0_21, %c0_22], %23 {strides = array<i32>} : memref<2x256xf32, #tpu.memory_space<vmem>>, vector<2x128xf32>,
    %c0_23 = arith.constant 0 : index
    %c128 = arith.constant 128 : index
    %85 = vector.load %arg3[%c0_23, %c128] : memref<2x256xf32, #tpu.memory_space<vmem>>, vector<2x128xf32>
    tpu.vector_store %arg3[%c0_23, %c128], %83 {strides = array<i32>} : memref<2x256xf32, #tpu.memory_space<vmem>>, vector<2x128xf32>,
    return
  }
}

</mosaic_0001>

<bundles_post_ra>
// kernel: act.1
= control target key start
LH: loop header
LB: loop body
LE: loop exit
PB: predicated region body
PF: predicated region fallthrough
CT: control target
= control target key end

     0   :  { %vm27_vm0 = vcmask 1043456   ;;  %vm23_vm1 = vcmask 162816   ;;  %vm53_vm2 = vcmask 261120   ;;  %v77_v11 = vlaneseq  ;;  %s245_s1 = inlined_call_operand.vmem [shape: f32[20,32], index: 1, kind: input, shape index: {}]   ;;  %s246_s0 = inlined_call_operand.vmem [shape: f32[2,20], index: 0, kind: input, shape index: {}]   ;;  %s247_s2 = inlined_call_operand.vmem [shape: f32[33,128], index: 2, kind: input, shape index: {}]   ;;  %s248_s3 = inlined_call_operand.vmem [shape: f32[2,256], index: 3, kind: output, shape index: {}]  }
   0x1   :  { %v17_v0 = vld [vmem:[%s245_s1 + $0x10] sm:$0xf]  ;;  %v16_v1 = vld [vmem:[%s245_s1 + $0x8] sm:$0xff]  ;;  %v15_v2 = vld [vmem:[%s245_s1] sm:$0xff]  ;;  %vm81_vm4 = vcmask 1041408  }
   0x2   :  { %155 = vmatpush.msk.msra.mxu0 %vm27_vm0, %v17_v0  ;;  %v14_v3 = vld [vmem:[%s246_s0] sm:$0x3]  ;;  %v21_v4 = vld [vmem:[%s247_s2 + $0x18] sm:$0xff]  ;;  %v20_v5 = vld [vmem:[%s247_s2 + $0x10] sm:$0xff]  ;;  %v213_v12 = vand.u32 127, %v77_v11 }
   0x3   :  { %69 = vmatpush.msra.mxu1 %v21_v4  ;;  %v19_v6 = vld [vmem:[%s247_s2 + $0x8] sm:$0xff]  ;;  %v18_v7 = vld [vmem:[%s247_s2] sm:$0xff] }
   0x4   :  { %45 = vmatpush.msra.mxu0 %v16_v1  ;;  %v158_v13 = vld [vmem:[%s247_s2 + $0x20] ss:$0 sm:$0xff]  ;;  %vm79_vm3 = vcmp.lt.s32.totalorder %v213_v12, 4  ;;  %v119_v18 = vcvt.s32.f32 %v213_v12  ;;  %vm114_vm11 = vcmp.eq.s32.totalorder %v213_v12, 4  ;;  %vm137_vm12 = vcmp.eq.s32.totalorder %v213_v12, 32 }
   0x5   :  { %70 = vmatpush.msra.mxu1 %v20_v5  ;;  %vm139_vm13 = vcmp.eq.s32.totalorder %v213_v12, 33  ;;  %vm141_vm14 = vcmp.eq.s32.totalorder %v213_v12, 34  ;;  %vm143_vm15 = vcmp.eq.s32.totalorder %v213_v12, 35  ;;  %vm145_vm0 = vcmp.eq.s32.totalorder %v213_v12, 36 }
   0x6   :  { %46 = vmatpush.msra.mxu0 %v15_v2 }
   0x7   :  { %156 = vmatmul.msk.f32.vlgmr.msra.gmra.mxu0 %vm23_vm1, %v14_v3  ;;  %71 = vmatpush.msra.mxu1 %v19_v6  ;;  %vm147_vm1 = vcmp.eq.s32.totalorder %v213_v12, 37 }
   0x9   :  { %72 = vmatpush.msra.mxu1 %v18_v7 }
  0x84   :  { %v48_v8 = vpop.f32.mrf.mxu0 }
  0x85   :  { %159 = vtanh.f32 %v48_v8 }
  0x8b   :  { %v160_v9 = vpop.eup %159 }
  0x8c   :  { %157 = vmatmul.msk.f32.vlgmr.msra.gmra.mxu1 %vm53_vm2, %v160_v9  ;;  %v211_v10 = vsel %vm53_vm2, %v160_v9, 0.0 }
 0x109   :  { %v74_v14 = vpop.f32.mrf.mxu1 }
 0x10a   :  { %v75_v15 = vadd.f32 %v158_v13, %v74_v14 }
 0x10c   :  { %v80_v16 = vsel %vm79_vm3, %v75_v15, -1e+30  ;;  %v115_v43 = vsel %vm114_vm11, %v75_v15, 0.0 }
 0x10d   :  { %v82_v17 = vsel %vm81_vm4, %v80_v16, -inf  ;;  %v116_v44 = vsel %vm81_vm4, %v115_v43, 0.0 }
 0x10e   :  { %83 = vmax.xlane.f32.xlu0 %v82_v17 }
 0x181   :  { %v221_v19 = vpop.xlane.xlu0 %83 }
 0x182   :  { %v85_v20 = vsub.f32 %v80_v16, %v221_v19  ;;  %vm120_vm5 = vcmp.eq.f32.partialorder %v80_v16, %v221_v19 }
 0x183   :  { %vm121_vm6 = vmand %vm120_vm5, %vm79_vm3 }
 0x184   :  { %v86_v21 = vmul.f32 1.442695, %v85_v20  ;;  %v122_v22 = vsel %vm121_vm6, %v119_v18, 128.0 }
 0x185   :  { %v123_v23 = vsel %vm81_vm4, %v122_v22, inf }
 0x186   :  { %161 = vpow2.f32 %v86_v21  ;;  %124 = vmin.xlane.f32.xlu2 %v123_v23 }
 0x18c   :  { %v162_v24 = vpop.eup %161 }
 0x18d   :  { %v88_v25 = vsel %vm81_vm4, %v162_v24, 0.0 }
 0x18e   :  { %89 = vadd.xlane.f32.xlu0 %v88_v25 }
 0x1f9   :  { %v125_v53 = vpop.xlane.xlu2 %124 }
 0x201   :  { %v90_v26 = vpop.xlane.xlu0 %89 }
 0x202   :  { %163 = vlog2.f32 %v90_v26  ;;  %v105_v33 = vand.u32 2147483648, %v90_v26  ;;  %v103_v35 = vand.u32 2147483647, %v90_v26  ;;  %vm99_vm8 = vweird.f32 %v90_v26 }
 0x203   :  { %165 = vrcp.f32 %v90_v26 }
 0x204   :  { %v106_v37 = vor.u32 1.1754944e-38, %v105_v33  ;;  %vm104_vm10 = vcmp.eq.f32.partialorder %v103_v35, 8.507059e+37 }
 0x208   :  { %v164_v27 = vpop.eup %163 }
 0x209   :  { %v166_v28 = vpop.eup %165  ;;  %v92_v29 = vmul.f32 0.6931472, %v164_v27 }
 0x20a   :  { %v95_v30 = vmul.f32 %v166_v28, %v90_v26  ;;  %vm100_vm7 = vweird.f32 %v166_v28 }
 0x20b   :  { %v93_v31 = vsub.f32 %v85_v20, %v92_v29  ;;  %vm101_vm9 = vmor %vm99_vm8, %vm100_vm7  ;;  %v126_v54 = vsub.f32 0.0, %v92_v29  ;;  %v135_v62 = vadd.f32 %v92_v29, %v221_v19 }
 0x20c   :  { %v96_v32 = vsub.f32 1.0, %v95_v30 }
 0x20d   :  { %149 = vst [vmem:[%s248_s3] sm:$0x3] %v93_v31 }
 0x20e   :  { %v97_v34 = vmul.f32 %v166_v28, %v96_v32 }
 0x210   :  { %v98_v36 = vadd.f32 %v166_v28, %v97_v34 }
 0x212   :  { %v102_v38 = vsel %vm101_vm9, %v166_v28, %v98_v36 }
 0x213   :  { %v107_v39 = vsel %vm104_vm10, %v106_v37, %v102_v38 }
 0x214   :  { %v108_v40 = vmul.f32 %v162_v24, %v107_v39 }
 0x216   :  { %v109_v41 = vmul.f32 %v108_v40, %v93_v31 }
 0x218   :  { %v110_v42 = vsel %vm81_vm4, %v109_v41, 0.0 }
 0x219   :  { %111 = vadd.xlane.f32.xlu1 %v110_v42 }
 0x221   :  { %117 = vadd.xlane.f32.xlu1 %v116_v44 }
 0x28c   :  { %v112_v45 = vpop.xlane.xlu1 %111 }
 0x28d   :  { %v113_v46 = vsub.f32 0.0, %v112_v45 }
 0x28f   :  { %v127_v47 = vsel %vm81_vm4, %v113_v46, 0.0  ;;  %v138_v51 = vsel %vm137_vm12, %v113_v46, %v211_v10 }
 0x290   :  { %v128_v48 = vrot.slane %v127_v47, 4 }
 0x292   :  { %v129_v49 = vadd.f32 %v128_v48, %v127_v47 }
 0x294   :  { %v130_v50 = vrot.slane %v129_v49, 2  ;;  %v118_v52 = vpop.xlane.xlu1 %117 }
 0x295   :  { %v140_v55 = vsel %vm139_vm13, %v118_v52, %v138_v51 }
 0x296   :  { %v131_v56 = vadd.f32 %v130_v50, %v129_v49  ;;  %v142_v57 = vsel %vm141_vm14, %v125_v53, %v140_v55 }
 0x297   :  { %v144_v58 = vsel %vm143_vm15, %v126_v54, %v142_v57 }
 0x298   :  { %v132_v59 = vrot.slane %v131_v56, 1 }
 0x29a   :  { %v133_v60 = vadd.f32 %v132_v59, %v131_v56 }
 0x29c   :  { %v134_v61 = vmul.f32 0.5, %v133_v60 }
 0x29e   :  { %v146_v63 = vsel %vm145_vm0, %v134_v61, %v144_v58 }
 0x29f   :  { %v148_v0 = vsel %vm147_vm1, %v135_v62, %v146_v63 }
 0x2a0   :  { %150 = vst [vmem:[%s248_s3 + $0x2] sm:$0x3] %v148_v0 }

</bundles_post_ra>
